<compile_context>
chip_gen: v7x
topology: tpu7x:2x2x1
jax: 0.10.0
libtpu: 0.0.40
codegen_flags: <defaults>
</compile_context>

<pallas_src>
import functools
import math

import jax
import jax.numpy as jnp
from jax.experimental import pallas as pl
from jax.experimental.pallas import tpu as pltpu


def _output_proj_kernel(x_ref, top_ref, bot_ref, w_ref, b_ref, out_ref,
                        xpad_ref, col_ref, *, W, C_in, L_tile, apron):
    """One (batch, row-tile) grid step.

    x_ref   : (C_in, L_tile)       bf16 channel-major tile (R image rows)
    top_ref : (C_in, 8*W)          bf16 8-row block holding the halo row above the tile
    bot_ref : (C_in, 8*W)          bf16 8-row block holding the halo row below the tile
    w_ref   : (C_out_pad, 9*C_in)  bf16 fused conv weight
    b_ref   : (C_out_pad, 1)       f32 bias
    out_ref : (C_out_pad, L_tile)  f32 output tile (lane-dense stores)
    xpad_ref: (C_in, XW)           bf16 scratch: zero-apron + halo + tile flat window
    col_ref : (9*C_in, L_tile)     bf16 scratch: im2col slab
    """
    t = pl.program_id(1)
    num_t = pl.num_programs(1)
    A = apron
    bf = xpad_ref.dtype

    # ---- Assemble the apron-carrying flat window in VMEM scratch.
    # xpad lane j holds flat image pixel (tile_start - W - 1) + (j - (A - W - 1)).
    # Lanes [0, A-W-1) are never read.  The two extreme apron pixels are always
    # border-masked, but are zeroed anyway so stale-VMEM NaNs cannot leak via 0*x.
    zcol = jnp.zeros((C_in, 1), bf)
    xpad_ref[:, pl.ds(A - W - 1, 1)] = zcol
    xpad_ref[:, pl.ds(A + L_tile + W, 1)] = zcol
    xpad_ref[:, pl.ds(A, L_tile)] = x_ref[...]           # 128-lane-aligned tile store

    @pl.when(t > 0)
    def _():
        # Row above the tile = local row 7 of the clamped 8-row halo block.
        xpad_ref[:, pl.ds(A - W, W)] = top_ref[:, pl.ds(7 * W, W)]

    @pl.when(t == 0)
    def _():
        xpad_ref[:, pl.ds(A - W, W)] = jnp.zeros((C_in, W), bf)

    @pl.when(t < num_t - 1)
    def _():
        # Row below the tile = local row 0 of the clamped 8-row halo block.
        xpad_ref[:, pl.ds(A + L_tile, W)] = bot_ref[:, pl.ds(0, W)]

    @pl.when(t == num_t - 1)
    def _():
        xpad_ref[:, pl.ds(A + L_tile, W)] = jnp.zeros((C_in, W), bf)

    # ---- Image-column border masks, generated in-kernel (no mask input / DMA).
    col_idx = jax.lax.broadcasted_iota(jnp.int32, (1, L_tile), 1) % W
    mask_l = (col_idx >= 1).astype(bf)        # zero the dx == 0 taps at column 0
    mask_r = (col_idx <= W - 2).astype(bf)    # zero the dx == 2 taps at column W-1

    # ---- im2col slab: 9 statically shifted, border-masked reads from the apron
    # scratch ref; sublane-aligned slab stores (C_in % 16 == 0 asserted in wrapper).
    for dy in range(3):
        for dx in range(3):
            tap = dy * 3 + dx
            start = A - W - 1 + dy * W + dx
            shifted = xpad_ref[:, pl.ds(start, L_tile)]
            if dx == 0:
                shifted = shifted * mask_l
            elif dx == 2:
                shifted = shifted * mask_r
            col_ref[pl.ds(tap * C_in, C_in), :] = shifted

    # ---- Single fused MXU matmul, K = 9*C_in, f32 accumulation + bias epilogue.
    acc = jnp.dot(w_ref[...], col_ref[...], preferred_element_type=jnp.float32)
    # act_layer / norm_layer are None in the module defaults -> nothing else to do.
    out_ref[...] = (acc + b_ref[...]).astype(out_ref.dtype)


def _pick_rows_per_tile(H, W, C_in, slab_budget_bytes):
    """Largest row tile R (multiple of 8, dividing H) whose bf16 im2col slab fits
    the budget; prefers >= 2 tiles per image so both v7x TensorCores get work."""
    cands = [r for r in range(8, H + 1, 8)
             if H % r == 0 and 9 * C_in * r * W * 2 <= slab_budget_bytes]
    if not cands:
        return 8
    multi = [r for r in cands if H // r >= 2]
    return max(multi) if multi else max(cands)


def output_projection(x, weight_oihw, bias, *, rows_per_tile=None,
                      slab_budget_bytes=16 * 1024 * 1024):
    """Pallas implementation of OutputProjection.forward.

    x           : (B, L, C_in) f32 tokens, L = H*W with H == W
    weight_oihw : (C_out, C_in, 3, 3) f32 (PyTorch Conv2d layout)
    bias        : (C_out,) f32
    returns     : (B, C_out, H, W) f32
    """
    B, L, C_in = x.shape
    C_out = weight_oihw.shape[0]
    H = W = int(math.isqrt(L))
    assert H * W == L, "sequence length must be a perfect square"
    assert H % 8 == 0 and W % 16 == 0, "image dims must be 8/16-aligned for tiling"
    assert C_in % 16 == 0, "C_in must be a multiple of 16 (bf16 sublane pack)"

    C_out_pad = max(8, ((C_out + 7) // 8) * 8)     # sublane-align the tiny C_out

    R = rows_per_tile if rows_per_tile is not None else _pick_rows_per_tile(
        H, W, C_in, slab_budget_bytes)
    assert R % 8 == 0 and H % R == 0, (R, H)
    T = H // R                                     # row tiles per image
    Rb = R // 8                                    # tile size in 8-row halo blocks
    n_hblk = H // 8                                # 8-row halo blocks per image
    L_tile = R * W                                 # lanes per tile (multiple of 128)
    A = ((W + 1 + 127) // 128) * 128               # 128-aligned left apron width
    XW = A + L_tile + W + 1                        # apron-window lane count

    # TODO(synk): this transpose+cast is still a separate XLA pass over x in HBM
    # (read f32, write bf16); fuse it into the upstream producer (or switch to
    # natural-layout blocks + on-chip transpose) for end-to-end throughput.
    xt = jnp.transpose(x, (0, 2, 1)).astype(jnp.bfloat16)          # (B, C_in, L)

    # Fused conv weight: w2[o, (dy*3+dx)*C_in + c] = weight[o, c, dy, dx].
    w2 = jnp.transpose(weight_oihw, (0, 2, 3, 1)).reshape(C_out, 9 * C_in)
    w2 = jnp.pad(w2, ((0, C_out_pad - C_out), (0, 0))).astype(jnp.bfloat16)
    b2 = jnp.pad(bias, (0, C_out_pad - C_out)).reshape(C_out_pad, 1)
    b2 = b2.astype(jnp.float32)

    kernel = functools.partial(_output_proj_kernel, W=W, C_in=C_in,
                               L_tile=L_tile, apron=A)

    in_specs = [
        # Current tile (channel-major, lane-dense).
        pl.BlockSpec((None, C_in, L_tile), lambda b, t: (b, 0, t)),
        # 8-row block containing the halo row ABOVE the tile (clamped at the top
        # of the image; the kernel zeroes it when t == 0).
        pl.BlockSpec((None, C_in, 8 * W),
                     lambda b, t: (b, 0, jnp.maximum(t * Rb - 1, 0))),
        # 8-row block containing the halo row BELOW the tile (clamped at the
        # bottom of the image; the kernel zeroes it when t == T-1).
        pl.BlockSpec((None, C_in, 8 * W),
                     lambda b, t: (b, 0, jnp.minimum((t + 1) * Rb, n_hblk - 1))),
        pl.BlockSpec((C_out_pad, 9 * C_in), lambda b, t: (0, 0)),
        pl.BlockSpec((C_out_pad, 1), lambda b, t: (0, 0)),
    ]
    out_specs = pl.BlockSpec((None, C_out_pad, L_tile), lambda b, t: (b, 0, t))

    # Rough per-step VMEM footprint (double-buffered I/O + scratch) -> scoped
    # limit with headroom, capped well below v7x's 64 MiB physical VMEM.
    vmem_est = (9 * C_in * L_tile * 2 + C_in * XW * 2
                + 2 * C_in * L_tile * 2 + 2 * 2 * C_in * 8 * W * 2
                + 2 * C_out_pad * L_tile * 4
                + C_out_pad * 9 * C_in * 2 + C_out_pad * 4)
    vmem_limit = int(min(48 * 2 ** 20, max(16 * 2 ** 20, 4 * vmem_est)))

    flops = 2 * B * L * (9 * C_in) * C_out_pad
    bytes_accessed = (B * C_in * L * 2 + B * T * 2 * (C_in * 8 * W * 2)
                      + w2.size * 2 + b2.size * 4 + B * C_out_pad * L * 4)

    out = pl.pallas_call(
        kernel,
        out_shape=jax.ShapeDtypeStruct((B, C_out_pad, L), jnp.float32),
        grid_spec=pltpu.PrefetchScalarGridSpec(
            num_scalar_prefetch=0,
            grid=(B, T),
            in_specs=in_specs,
            out_specs=out_specs,
            scratch_shapes=[
                pltpu.VMEM((C_in, XW), jnp.bfloat16),          # apron window
                pltpu.VMEM((9 * C_in, L_tile), jnp.bfloat16),  # im2col slab
            ],
        ),
        compiler_params=pltpu.CompilerParams(
            dimension_semantics=("parallel", "parallel"),
            vmem_limit_bytes=vmem_limit),
        cost_estimate=pl.CostEstimate(
            flops=flops, transcendentals=0, bytes_accessed=bytes_accessed),
    )(xt, xt, xt, w2, b2)
    # NOTE: downstream consumers that tolerate bf16 / the padded channel axis can
    # consume `out` (B, C_out_pad, L) directly and skip the slice + reshape below.
    return out[:, :C_out, :].reshape(B, C_out, H, W)


def _reference(x, weight_oihw, bias):
    """Pure-JAX reference: tokens -> NCHW -> conv3x3(pad=1) -> NCHW image."""
    B, L, C_in = x.shape
    H = W = int(math.isqrt(L))
    # Mirror the kernel's bf16 operand rounding (accumulation stays f32).
    xb = x.astype(jnp.bfloat16).astype(jnp.float32)
    wb = weight_oihw.astype(jnp.bfloat16).astype(jnp.float32)
    img = jnp.transpose(xb, (0, 2, 1)).reshape(B, C_in, H, W)
    y = jax.lax.conv_general_dilated(
        img, wb, window_strides=(1, 1), padding=((1, 1), (1, 1)),
        dimension_numbers=("NCHW", "OIHW", "NCHW"))
    return y + bias.reshape(1, -1, 1, 1)


if __name__ == "__main__":
    key = jax.random.PRNGKey(0)
    k_x, k_w, k_b = jax.random.split(key, 3)

    # Module defaults: in_channels=64, out_channels=3; small spatial size.
    B, H, W = 2, 16, 16
    C_in, C_out = 64, 3
    L = H * W

    x = jax.random.normal(k_x, (B, L, C_in), dtype=jnp.float32)
    weight = 0.05 * jax.random.normal(k_w, (C_out, C_in, 3, 3), dtype=jnp.float32)
    bias = 0.05 * jax.random.normal(k_b, (C_out,), dtype=jnp.float32)

    out = output_projection(x, weight, bias)   # demo auto-tiles to 2 row tiles/image
    out = jax.block_until_ready(out)

    ref = _reference(x, weight, bias)
    assert out.shape == (B, C_out, H, W), out.shape
    err = float(jnp.max(jnp.abs(out - ref)))
    assert jnp.allclose(out, ref, atol=2e-3, rtol=2e-3), f"max err {err}"

    print("KERNEL_OK")
</pallas_src>

<mosaic_0001>
module attributes {stable_mosaic.version = 11 : i64} {
  func.func @_output_proj_kernel(%arg0: i32, %arg1: i32, %arg2: memref<1x64x128xbf16, #tpu.memory_space<vmem>>, %arg3: memref<1x64x128xbf16, #tpu.memory_space<vmem>>, %arg4: memref<1x64x128xbf16, #tpu.memory_space<vmem>>, %arg5: memref<8x576xbf16, #tpu.memory_space<vmem>>, %arg6: memref<8x1xf32, #tpu.memory_space<vmem>>, %arg7: memref<1x8x128xf32, #tpu.memory_space<vmem>>, %arg8: memref<64x273xbf16, #tpu.memory_space<vmem>>, %arg9: memref<576x128xbf16, #tpu.memory_space<vmem>>) attributes {dimension_semantics = [#tpu.dimension_semantics<parallel>, #tpu.dimension_semantics<parallel>], iteration_bounds = array<i64: 2, 2>, scalar_prefetch = 0 : i64, scratch_operands = 2 : i64, tpu.core_type = #tpu.core_type<tc>, window_params = [{transform_indices = @transform_0, window_bounds = array<i64: 1, 64, 128>}, {transform_indices = @transform_1, window_bounds = array<i64: 1, 64, 128>}, {transform_indices = @transform_2, window_bounds = array<i64: 1, 64, 128>}, {pipeline_mode = #tpu.pipeline_mode<synchronous>, transform_indices = @transform_3, window_bounds = array<i64: 8, 576>}, {pipeline_mode = #tpu.pipeline_mode<synchronous>, transform_indices = @transform_4, window_bounds = array<i64: 8, 1>}, {transform_indices = @transform_5, window_bounds = array<i64: 1, 8, 128>}]} {
    %cst = arith.constant 0.000000e+00 : bf16
    %0 = vector.broadcast %cst : bf16 to vector<64x1xbf16>
    %c0 = arith.constant 0 : index
    %c111 = arith.constant 111 : index
    %1 = vector.load %arg8[%c0, %c111] : memref<64x273xbf16, #tpu.memory_space<vmem>>, vector<64x1xbf16>
    tpu.vector_store %arg8[%c0, %c111], %0 {strides = array<i32>} : memref<64x273xbf16, #tpu.memory_space<vmem>>, vector<64x1xbf16>,
    %c0_0 = arith.constant 0 : index
    %c272 = arith.constant 272 : index
    %2 = vector.load %arg8[%c0_0, %c272] : memref<64x273xbf16, #tpu.memory_space<vmem>>, vector<64x1xbf16>
    tpu.vector_store %arg8[%c0_0, %c272], %0 {strides = array<i32>} : memref<64x273xbf16, #tpu.memory_space<vmem>>, vector<64x1xbf16>,
    %c0_1 = arith.constant 0 : index
    %c0_2 = arith.constant 0 : index
    %c0_3 = arith.constant 0 : index
    %3 = vector.load %arg2[%c0_1, %c0_2, %c0_3] : memref<1x64x128xbf16, #tpu.memory_space<vmem>>, vector<1x64x128xbf16>
    %4 = vector.shape_cast %3 : vector<1x64x128xbf16> to vector<64x128xbf16>
    %c0_4 = arith.constant 0 : index
    %c128 = arith.constant 128 : index
    %5 = vector.load %arg8[%c0_4, %c128] : memref<64x273xbf16, #tpu.memory_space<vmem>>, vector<64x128xbf16>
    tpu.vector_store %arg8[%c0_4, %c128], %4 {strides = array<i32>} : memref<64x273xbf16, #tpu.memory_space<vmem>>, vector<64x128xbf16>,
    %c0_i32 = arith.constant 0 : i32
    %6 = arith.cmpi sgt, %arg1, %c0_i32 : i32
    %7 = arith.extui %6 : i1 to i32
    %c0_i32_5 = arith.constant 0 : i32
    %8 = arith.cmpi ne, %7, %c0_i32_5 : i32
    scf.if %8 {
      %c0_49 = arith.constant 0 : index
      %c0_50 = arith.constant 0 : index
      %c112_51 = arith.constant 112 : index
      %84 = vector.load %arg3[%c0_49, %c0_50, %c112_51] : memref<1x64x128xbf16, #tpu.memory_space<vmem>>, vector<1x64x16xbf16>
      %85 = vector.shape_cast %84 : vector<1x64x16xbf16> to vector<64x16xbf16>
      %c0_52 = arith.constant 0 : index
      %c112_53 = arith.constant 112 : index
      %86 = vector.load %arg8[%c0_52, %c112_53] : memref<64x273xbf16, #tpu.memory_space<vmem>>, vector<64x16xbf16>
      tpu.vector_store %arg8[%c0_52, %c112_53], %85 {strides = array<i32>} : memref<64x273xbf16, #tpu.memory_space<vmem>>, vector<64x16xbf16>,
    } else {
    }
    %c0_i32_6 = arith.constant 0 : i32
    %9 = arith.cmpi eq, %arg1, %c0_i32_6 : i32
    %10 = arith.extui %9 : i1 to i32
    %c0_i32_7 = arith.constant 0 : i32
    %11 = arith.cmpi ne, %10, %c0_i32_7 : i32
    scf.if %11 {
      %cst_49 = arith.constant 0.000000e+00 : bf16
      %84 = vector.broadcast %cst_49 : bf16 to vector<64x16xbf16>
      %c0_50 = arith.constant 0 : index
      %c112_51 = arith.constant 112 : index
      %85 = vector.load %arg8[%c0_50, %c112_51] : memref<64x273xbf16, #tpu.memory_space<vmem>>, vector<64x16xbf16>
      tpu.vector_store %arg8[%c0_50, %c112_51], %84 {strides = array<i32>} : memref<64x273xbf16, #tpu.memory_space<vmem>>, vector<64x16xbf16>,
    } else {
    }
    %c1_i32 = arith.constant 1 : i32
    %12 = arith.cmpi slt, %arg1, %c1_i32 : i32
    %13 = arith.extui %12 : i1 to i32
    %c0_i32_8 = arith.constant 0 : i32
    %14 = arith.cmpi ne, %13, %c0_i32_8 : i32
    scf.if %14 {
      %c0_49 = arith.constant 0 : index
      %c0_50 = arith.constant 0 : index
      %c0_51 = arith.constant 0 : index
      %84 = vector.load %arg4[%c0_49, %c0_50, %c0_51] : memref<1x64x128xbf16, #tpu.memory_space<vmem>>, vector<1x64x16xbf16>
      %85 = vector.shape_cast %84 : vector<1x64x16xbf16> to vector<64x16xbf16>
      %c0_52 = arith.constant 0 : index
      %c256_53 = arith.constant 256 : index
      %86 = vector.load %arg8[%c0_52, %c256_53] : memref<64x273xbf16, #tpu.memory_space<vmem>>, vector<64x16xbf16>
      tpu.vector_store %arg8[%c0_52, %c256_53], %85 {strides = array<i32>} : memref<64x273xbf16, #tpu.memory_space<vmem>>, vector<64x16xbf16>,
    } else {
    }
    %c1_i32_9 = arith.constant 1 : i32
    %15 = arith.cmpi eq, %arg1, %c1_i32_9 : i32
    %16 = arith.extui %15 : i1 to i32
    %c0_i32_10 = arith.constant 0 : i32
    %17 = arith.cmpi ne, %16, %c0_i32_10 : i32
    scf.if %17 {
      %cst_49 = arith.constant 0.000000e+00 : bf16
      %84 = vector.broadcast %cst_49 : bf16 to vector<64x16xbf16>
      %c0_50 = arith.constant 0 : index
      %c256_51 = arith.constant 256 : index
      %85 = vector.load %arg8[%c0_50, %c256_51] : memref<64x273xbf16, #tpu.memory_space<vmem>>, vector<64x16xbf16>
      tpu.vector_store %arg8[%c0_50, %c256_51], %84 {strides = array<i32>} : memref<64x273xbf16, #tpu.memory_space<vmem>>, vector<64x16xbf16>,
    } else {
    }
    %18 = tpu.iota {dimensions = array<i32: 1>} : vector<1x128xi32>
    %c16_i32 = arith.constant 16 : i32
    %c0_i32_11 = arith.constant 0 : i32
    %19 = arith.cmpi eq, %c16_i32, %c0_i32_11 : i32
    %c1_i32_12 = arith.constant 1 : i32
    %20 = arith.select %19, %c1_i32_12, %c16_i32 : i32
    %21 = vector.broadcast %20 : i32 to vector<1x128xi32>
    %22 = arith.remsi %18, %21 : vector<1x128xi32>
    %c0_i32_13 = arith.constant 0 : i32
    %23 = vector.broadcast %c0_i32_13 : i32 to vector<1x128xi32>
    %24 = arith.cmpi ne, %22, %23 : vector<1x128xi32>
    %c0_i32_14 = arith.constant 0 : i32
    %25 = vector.broadcast %c0_i32_14 : i32 to vector<1x128xi32>
    %26 = arith.cmpi slt, %22, %25 : vector<1x128xi32>
    %c0_i32_15 = arith.constant 0 : i32
    %27 = arith.cmpi slt, %20, %c0_i32_15 : i32
    %28 = vector.broadcast %27 : i1 to vector<1x128xi1>
    %29 = vector.broadcast %28 : vector<1x128xi1> to vector<1x128xi1>
    %30 = arith.xori %26, %29 : vector<1x128xi1>
    %31 = arith.andi %30, %24 : vector<1x128xi1>
    %32 = vector.broadcast %20 : i32 to vector<1x128xi32>
    %33 = arith.addi %22, %32 : vector<1x128xi32>
    %34 = arith.select %31, %33, %22 : vector<1x128xi1>, vector<1x128xi32>
    %c1_i32_16 = arith.constant 1 : i32
    %35 = vector.broadcast %c1_i32_16 : i32 to vector<1x128xi32>
    %36 = arith.cmpi sge, %34, %35 : vector<1x128xi32>
    %37 = arith.extui %36 : vector<1x128xi1> to vector<1x128xi32>
    %38 = arith.sitofp %37 : vector<1x128xi32> to vector<1x128xf32>
    %39 = arith.truncf %38 : vector<1x128xf32> to vector<1x128xbf16>
    %c14_i32 = arith.constant 14 : i32
    %40 = vector.broadcast %c14_i32 : i32 to vector<1x128xi32>
    %41 = arith.cmpi sle, %34, %40 : vector<1x128xi32>
    %42 = arith.extui %41 : vector<1x128xi1> to vector<1x128xi32>
    %43 = arith.sitofp %42 : vector<1x128xi32> to vector<1x128xf32>
    %44 = arith.truncf %43 : vector<1x128xf32> to vector<1x128xbf16>
    %c0_17 = arith.constant 0 : index
    %c111_18 = arith.constant 111 : index
    %45 = vector.load %arg8[%c0_17, %c111_18] : memref<64x273xbf16, #tpu.memory_space<vmem>>, vector<64x128xbf16>
    %46 = vector.broadcast %39 : vector<1x128xbf16> to vector<64x128xbf16>
    %47 = arith.mulf %45, %46 : vector<64x128xbf16>
    %c0_19 = arith.constant 0 : index
    %c0_20 = arith.constant 0 : index
    %48 = vector.load %arg9[%c0_19, %c0_20] : memref<576x128xbf16, #tpu.memory_space<vmem>>, vector<64x128xbf16>
    tpu.vector_store %arg9[%c0_19, %c0_20], %47 {strides = array<i32>} : memref<576x128xbf16, #tpu.memory_space<vmem>>, vector<64x128xbf16>,
    %c0_21 = arith.constant 0 : index
    %c112 = arith.constant 112 : index
    %49 = vector.load %arg8[%c0_21, %c112] : memref<64x273xbf16, #tpu.memory_space<vmem>>, vector<64x128xbf16>
    %c64 = arith.constant 64 : index
    %c0_22 = arith.constant 0 : index
    %50 = vector.load %arg9[%c64, %c0_22] : memref<576x128xbf16, #tpu.memory_space<vmem>>, vector<64x128xbf16>
    tpu.vector_store %arg9[%c64, %c0_22], %49 {strides = array<i32>} : memref<576x128xbf16, #tpu.memory_space<vmem>>, vector<64x128xbf16>,
    %c0_23 = arith.constant 0 : index
    %c113 = arith.constant 113 : index
    %51 = vector.load %arg8[%c0_23, %c113] : memref<64x273xbf16, #tpu.memory_space<vmem>>, vector<64x128xbf16>
    %52 = vector.broadcast %44 : vector<1x128xbf16> to vector<64x128xbf16>
    %53 = arith.mulf %51, %52 : vector<64x128xbf16>
    %c128_24 = arith.constant 128 : index
    %c0_25 = arith.constant 0 : index
    %54 = vector.load %arg9[%c128_24, %c0_25] : memref<576x128xbf16, #tpu.memory_space<vmem>>, vector<64x128xbf16>
    tpu.vector_store %arg9[%c128_24, %c0_25], %53 {strides = array<i32>} : memref<576x128xbf16, #tpu.memory_space<vmem>>, vector<64x128xbf16>,
    %c0_26 = arith.constant 0 : index
    %c127 = arith.constant 127 : index
    %55 = vector.load %arg8[%c0_26, %c127] : memref<64x273xbf16, #tpu.memory_space<vmem>>, vector<64x128xbf16>
    %56 = vector.broadcast %39 : vector<1x128xbf16> to vector<64x128xbf16>
    %57 = arith.mulf %55, %56 : vector<64x128xbf16>
    %c192 = arith.constant 192 : index
    %c0_27 = arith.constant 0 : index
    %58 = vector.load %arg9[%c192, %c0_27] : memref<576x128xbf16, #tpu.memory_space<vmem>>, vector<64x128xbf16>
    tpu.vector_store %arg9[%c192, %c0_27], %57 {strides = array<i32>} : memref<576x128xbf16, #tpu.memory_space<vmem>>, vector<64x128xbf16>,
    %c0_28 = arith.constant 0 : index
    %c128_29 = arith.constant 128 : index
    %59 = vector.load %arg8[%c0_28, %c128_29] : memref<64x273xbf16, #tpu.memory_space<vmem>>, vector<64x128xbf16>
    %c256 = arith.constant 256 : index
    %c0_30 = arith.constant 0 : index
    %60 = vector.load %arg9[%c256, %c0_30] : memref<576x128xbf16, #tpu.memory_space<vmem>>, vector<64x128xbf16>
    tpu.vector_store %arg9[%c256, %c0_30], %59 {strides = array<i32>} : memref<576x128xbf16, #tpu.memory_space<vmem>>, vector<64x128xbf16>,
    %c0_31 = arith.constant 0 : index
    %c129 = arith.constant 129 : index
    %61 = vector.load %arg8[%c0_31, %c129] : memref<64x273xbf16, #tpu.memory_space<vmem>>, vector<64x128xbf16>
    %62 = vector.broadcast %44 : vector<1x128xbf16> to vector<64x128xbf16>
    %63 = arith.mulf %61, %62 : vector<64x128xbf16>
    %c320 = arith.constant 320 : index
    %c0_32 = arith.constant 0 : index
    %64 = vector.load %arg9[%c320, %c0_32] : memref<576x128xbf16, #tpu.memory_space<vmem>>, vector<64x128xbf16>
    tpu.vector_store %arg9[%c320, %c0_32], %63 {strides = array<i32>} : memref<576x128xbf16, #tpu.memory_space<vmem>>, vector<64x128xbf16>,
    %c0_33 = arith.constant 0 : index
    %c143 = arith.constant 143 : index
    %65 = vector.load %arg8[%c0_33, %c143] : memref<64x273xbf16, #tpu.memory_space<vmem>>, vector<64x128xbf16>
    %66 = vector.broadcast %39 : vector<1x128xbf16> to vector<64x128xbf16>
    %67 = arith.mulf %65, %66 : vector<64x128xbf16>
    %c384 = arith.constant 384 : index
    %c0_34 = arith.constant 0 : index
    %68 = vector.load %arg9[%c384, %c0_34] : memref<576x128xbf16, #tpu.memory_space<vmem>>, vector<64x128xbf16>
    tpu.vector_store %arg9[%c384, %c0_34], %67 {strides = array<i32>} : memref<576x128xbf16, #tpu.memory_space<vmem>>, vector<64x128xbf16>,
    %c0_35 = arith.constant 0 : index
    %c144 = arith.constant 144 : index
    %69 = vector.load %arg8[%c0_35, %c144] : memref<64x273xbf16, #tpu.memory_space<vmem>>, vector<64x128xbf16>
    %c448 = arith.constant 448 : index
    %c0_36 = arith.constant 0 : index
    %70 = vector.load %arg9[%c448, %c0_36] : memref<576x128xbf16, #tpu.memory_space<vmem>>, vector<64x128xbf16>
    tpu.vector_store %arg9[%c448, %c0_36], %69 {strides = array<i32>} : memref<576x128xbf16, #tpu.memory_space<vmem>>, vector<64x128xbf16>,
    %c0_37 = arith.constant 0 : index
    %c145 = arith.constant 145 : index
    %71 = vector.load %arg8[%c0_37, %c145] : memref<64x273xbf16, #tpu.memory_space<vmem>>, vector<64x128xbf16>
    %72 = vector.broadcast %44 : vector<1x128xbf16> to vector<64x128xbf16>
    %73 = arith.mulf %71, %72 : vector<64x128xbf16>
    %c512 = arith.constant 512 : index
    %c0_38 = arith.constant 0 : index
    %74 = vector.load %arg9[%c512, %c0_38] : memref<576x128xbf16, #tpu.memory_space<vmem>>, vector<64x128xbf16>
    tpu.vector_store %arg9[%c512, %c0_38], %73 {strides = array<i32>} : memref<576x128xbf16, #tpu.memory_space<vmem>>, vector<64x128xbf16>,
    %c0_39 = arith.constant 0 : index
    %c0_40 = arith.constant 0 : index
    %75 = vector.load %arg5[%c0_39, %c0_40] : memref<8x576xbf16, #tpu.memory_space<vmem>>, vector<8x576xbf16>
    %c0_41 = arith.constant 0 : index
    %c0_42 = arith.constant 0 : index
    %76 = vector.load %arg9[%c0_41, %c0_42] : memref<576x128xbf16, #tpu.memory_space<vmem>>, vector<576x128xbf16>
    %cst_43 = arith.constant dense<0.000000e+00> : vector<8x128xf32>
    %77 = tpu.matmul %75, %76, %cst_43 {dimension_numbers = #tpu.dot_dimension_numbers<[1], [0], [0], [1], [0, 0, 1, 1], [], []>} : vector<8x576xbf16>, vector<576x128xbf16>, vector<8x128xf32> -> vector<8x128xf32>
    %c0_44 = arith.constant 0 : index
    %c0_45 = arith.constant 0 : index
    %78 = vector.load %arg6[%c0_44, %c0_45] : memref<8x1xf32, #tpu.memory_space<vmem>>, vector<8x1xf32>
    %79 = vector.broadcast %78 : vector<8x1xf32> to vector<8x128xf32>
    %80 = arith.addf %77, %79 : vector<8x128xf32>
    %c0_46 = arith.constant 0 : index
    %c0_47 = arith.constant 0 : index
    %c0_48 = arith.constant 0 : index
    %81 = vector.load %arg7[%c0_46, %c0_47, %c0_48] : memref<1x8x128xf32, #tpu.memory_space<vmem>>, vector<1x8x128xf32>
    %82 = vector.shape_cast %81 : vector<1x8x128xf32> to vector<8x128xf32>
    %83 = vector.shape_cast %80 : vector<8x128xf32> to vector<1x8x128xf32>
    tpu.vector_store %arg7[%c0_46, %c0_47, %c0_48], %83 {strides = array<i32>} : memref<1x8x128xf32, #tpu.memory_space<vmem>>, vector<1x8x128xf32>,
    return
  }
  func.func @transform_0(%arg0: i32, %arg1: i32) -> (i32, i32, i32) {
    %c0_i32 = arith.constant 0 : i32
    %c0_i32_0 = arith.constant 0 : i32
    return %arg0, %c0_i32, %arg1 : i32, i32, i32
  }
  func.func @transform_1(%arg0: i32, %arg1: i32) -> (i32, i32, i32) {
    %c1_i32 = arith.constant 1 : i32
    %0 = arith.muli %arg1, %c1_i32 : i32
    %c1_i32_0 = arith.constant 1 : i32
    %1 = arith.subi %0, %c1_i32_0 : i32
    %c0_i32 = arith.constant 0 : i32
    %2 = arith.maxsi %1, %c0_i32 : i32
    %c0_i32_1 = arith.constant 0 : i32
    %c0_i32_2 = arith.constant 0 : i32
    return %arg0, %c0_i32_1, %2 : i32, i32, i32
  }
  func.func @transform_2(%arg0: i32, %arg1: i32) -> (i32, i32, i32) {
    %c1_i32 = arith.constant 1 : i32
    %0 = arith.addi %arg1, %c1_i32 : i32
    %c1_i32_0 = arith.constant 1 : i32
    %1 = arith.muli %0, %c1_i32_0 : i32
    %c1_i32_1 = arith.constant 1 : i32
    %2 = arith.minsi %1, %c1_i32_1 : i32
    %c0_i32 = arith.constant 0 : i32
    %c0_i32_2 = arith.constant 0 : i32
    return %arg0, %c0_i32, %2 : i32, i32, i32
  }
  func.func @transform_3(%arg0: i32, %arg1: i32) -> (i32, i32) {
    %c0_i32 = arith.constant 0 : i32
    %c0_i32_0 = arith.constant 0 : i32
    %c0_i32_1 = arith.constant 0 : i32
    return %c0_i32, %c0_i32_0 : i32, i32
  }
  func.func @transform_4(%arg0: i32, %arg1: i32) -> (i32, i32) {
    %c0_i32 = arith.constant 0 : i32
    %c0_i32_0 = arith.constant 0 : i32
    %c0_i32_1 = arith.constant 0 : i32
    return %c0_i32, %c0_i32_0 : i32, i32
  }
  func.func @transform_5(%arg0: i32, %arg1: i32) -> (i32, i32, i32) {
    %c0_i32 = arith.constant 0 : i32
    %c0_i32_0 = arith.constant 0 : i32
    return %arg0, %c0_i32, %arg1 : i32, i32, i32
  }
}

</mosaic_0001>

<bundles_post_ra>
// kernel: tpu_custom_call.1
= control target key start
LH: loop header
LB: loop body
LE: loop exit
PB: predicated region body
PF: predicated region fallthrough
CT: control target
= control target key end

     0   :  { %s2610_s0 = inlined_call_operand.hbm [shape: bf16[2,64,256], index: 0, kind: input, shape index: {}]   ;;  %s2611_s1 = inlined_call_operand.hbm [shape: bf16[2,64,256], index: 1, kind: input, shape index: {}]   ;;  %s2612_s2 = inlined_call_operand.hbm [shape: bf16[2,64,256], index: 2, kind: input, shape index: {}]   ;;  %s2613_s3 = inlined_call_operand.vmem [shape: bf16[8,576], index: 3, kind: input, shape index: {}]   ;;  %s2614_s4 = inlined_call_operand.vmem [shape: f32[8,1], index: 4, kind: input, shape index: {}]   ;;  %s2615_s5 = inlined_call_operand.hbm [shape: f32[2,8,256], index: 5, kind: output, shape index: {}]  }
   0x1   :  { %2639 = sst [smem:[#allocation25_spill]] %s2610_s0 }
   0x2   :  { %2640 = sst [smem:[#allocation26_spill]] %s2611_s1 }
   0x3   :  { %2641 = sst [smem:[#allocation27_spill]] %s2613_s3 }
   0x4   :  { %2642 = sst [smem:[#allocation28_spill]] %s2614_s4 }
   0x5   :  { %2643 = sst [smem:[#allocation29_spill]] %s2615_s5 }
   0x6   :  { %10 = vsyncpa [#allocation5], 0 }
   0x7   :  { %12 = vsyncpa [#allocation5 + $0x1], 0 }
   0x8   :  { %13 = vsyncpa [#allocation8], 0 }
   0x9   :  { %15 = vsyncpa [#allocation8 + $0x1], 0 }
   0xa   :  { %16 = vsyncpa [#allocation6], 0 }
   0xb   :  { %18 = vsyncpa [#allocation6 + $0x1], 0  ;;  %s1888_s18 = smov 0   ;;  %s1890_s19 = smov 0  }
   0xc   :  { %s1892_s20 = smov 0   ;;  %s1894_s21 = smov 0  }
   0xd   :  { %s1896_s22 = smov 0   ;;  %s1898_s23 = smov 0  }
   0xe   :  { %s1900_s24 = smov 0   ;;  %s1902_s25 = smov 0  }
   0xf   :  { %s1904_s26 = smov 0   ;;  %s1906_s27 = smov 0  }
  0x10   :  { %s1908_s28 = smov 0   ;;  %s1910_s29 = smov 0  }
  0x11   :  { %s1912_s30 = smov 0   ;;  %s1914_s6 = smov 0  }
  0x12 LB: > { %2644 = sst [smem:[#allocation15_spill]] %s1804_s23  ;;  %s1957_s7 = sadd.s32 4294967295, %s1836_s6   ;;  %s1836_s6 = sphi %s1914_s6, %s24_s6   ;;  %s1832_s30 = sphi %s1912_s30, %s2713_s30   ;;  %s1828_s29 = sphi %s1910_s29, %s2701_s29   ;;  %s1824_s28 = sphi %s1908_s28, %s2712_s28   ;;  %s1820_s27 = sphi %s1906_s27, %s2711_s27   ;;  %s1816_s26 = sphi %s1904_s26, %s2710_s26   ;;  %s1812_s25 = sphi %s1902_s25, %s2709_s25   ;;  %s1808_s24 = sphi %s1900_s24, %s2708_s24   ;;  %s1804_s23 = sphi %s1898_s23, %s2697_s23   ;;  %s1800_s22 = sphi %s1896_s22, %s2707_s22   ;;  %s1796_s21 = sphi %s1894_s21, %s2706_s21   ;;  %s1792_s20 = sphi %s1892_s20, %s2705_s20   ;;  %s1788_s19 = sphi %s1890_s19, %s2704_s19   ;;  %s1784_s18 = sphi %s1888_s18, %s2703_s18  }
  0x13   : > { %2645 = sst [smem:[#allocation16_spill]] %s1816_s26  ;;  %s33_s8 = sadd.s32 1, %s1828_s29 }
  0x14   : > { %2646 = sst [smem:[#allocation17_spill]] %s1820_s27  ;;  %p34_p0 = scmp.ge.s32.totalorder %s33_s8, 2 }
  0x15   : > { %2647 = sst [smem:[#allocation18_spill]] %s1824_s28  ;;  %s36_s9 = sadd.s32 1, %s1832_s30 }
  0x16   : > { %2648 = sst [smem:[#allocation19_spill]] %s1828_s29  ;;  %p2624_p1 = scmp.eq.s32.totalorder %s1836_s6, 0 }
  0x17   : > { %p2623_p2 = scmp.eq.s32.totalorder %s1957_s7, 0  ;;  %s2715_s8 = smov (%p34_p0, %s33_s8), 0 }
  0x18   : > { %2649 = sst [smem:[#allocation20_spill]] %s2715_s8  ;;  %s2717_s9 = smov (!%p34_p0, %s36_s9), %s1832_s30 }
  0x19   : > { %s41_s10 = ssub.s32 %s1828_s29, %s2715_s8  ;;  %p38_p3 = scmp.ge.s32.totalorder %s2717_s9, 2 }
  0x1a   : > { %s79_s11 = sadd.s32 1, %s1804_s23  ;;  %p86_p4 = scmp.ne.s32.totalorder %s1804_s23, %s1800_s22 }
  0x1b   : > { %s2719_s9 = smov (%p38_p3, %s2717_s9), 0  ;;  %p92_p6 = scmp.ne.s32.totalorder %s1800_s22, %s1796_s21 }
  0x1c   : > { %2650 = sst [smem:[#allocation21_spill]] %s2719_s9  ;;  %s1973_s12 = ssub.s32 %s1832_s30, %s2719_s9 }
  0x1d   : > { %s1976_s13 = sor.u32 %s41_s10, %s1973_s12  ;;  %p1984_p7 = por %p86_p4, %p2624_p1 }
  0x1e   : > { %p1990_p8 = por %p92_p6, %p2623_p2  ;;  %p2622_p9 = scmp.lt.s32.totalorder %s1836_s6, 4 }
  0x1f   : > { %p2621_p10 = scmp.eq.s32.totalorder %s1973_s12, 0  ;;  %s1314_s16 = sshll.u32 %s1832_s30, 4 }
  0x20   : > { %s2652_s15 = scalar_select %p1990_p8, 1, 0 }
  0x21   : > { %s2000_s17 = scalar_select %p2621_p10, %s1804_s23, %s79_s11  }
  0x22   : > { %s248_s21 = sand.u32 1, %s1836_s6   ;;  %s250_s10 = sand.u32 1, %s1804_s23  }
  0x23   : > { %2653 = sst [smem:[#allocation22_spill]] %s2000_s17  ;;  %s1316_s9 = sshll.u32 %s250_s10, 5 }
  0x24   : > { %s2620_s8 = sshll.u32 %s1832_s30, 10  ;;  %s2654_s1 = sld [smem:[#allocation26_spill]] }
  0x25   : > { %s252_s3 = scalar_lea.vmem [#allocation7], %s1316_s9  ;;  %p2018_p11 = pnand %p2622_p9, %p1984_p7 }
  0x26   : > { %s263_s27 = sshll.u32 %s252_s3, 4  ;;  %s2024_s5 = scalar_lea.sflag [#allocation8], %s248_s21  ;;  %s2012_s27 = int_to_ptr.vmem [resolvable:$true] %s263_s27 }
  0x27   : > { %p1590_p3 = pneg %p2018_p11 }
  0x2a   : > { %s2010_s4 = scalar_lea.hbm %s2654_s1, %s2620_s8  ;;  %s1593_s14 = scalar_lea.hbm %s2654_s1, 2048 }
  0x2b   : > { %s1588_s28 = scalar_lea.hbm %s2010_s4, 512  ;;  %p1594_p7 = scmp.lt.u32.totalorder %s2010_s4, %s2654_s1 }
  0x2c   : > { %p1589_p0 = scmp.ne.s32.totalorder %s2010_s4, %s1588_s28  ;;  %p1595_p10 = scmp.lt.u32.totalorder %s1593_s14, %s1588_s28 }
  0x2d   : > { %p1597_p2 = scmp.lt.u32.totalorder %s1588_s28, %s2010_s4 }
  0x2e   : > { %p1591_p4 = pnand %p1590_p3, %p1589_p0  ;;  %p1596_p9 = por %p1595_p10, %p1594_p7 }
  0x30   : > { %p1592_p6 = pneg %p1591_p4  ;;  %p1598_p1 = por %p1597_p2, %p1596_p9 }
  0x32   : > { %p1599_p5 = pnand %p1598_p1, %p1592_p6 }
  0x34   : > { %1602 = shalt.err (!%p1599_p5)
}
  0x35   : > { %s1603_s21 = scalar_lea.vmem %s2012_s27, 512  ;;  %s1838_s3 = smov [#allocation7]  }
  0x36   : > { %p1604_p0 = scmp.ne.s32.totalorder %s2012_s27, %s1603_s21  ;;  %s1608_s9 = sshll.u32 %s1838_s3, 4  ;;  %s1609_s9 = int_to_ptr.vmem [resolvable:$false] %s1608_s9 }
  0x37   : > { %s1610_s8 = scalar_lea.vmem %s1609_s9, 1024  ;;  %p1611_p13 = scmp.lt.s32.totalorder %s2012_s27, %s1609_s9 }
  0x38   : > { %p1606_p4 = pnand %p1604_p0, %p1590_p3  ;;  %p1612_p10 = scmp.lt.s32.totalorder %s1610_s8, %s1603_s21 }
  0x3a   : > { %p1607_p12 = pneg %p1606_p4  ;;  %p1613_p7 = por %p1612_p10, %p1611_p13 }
  0x3c   : > { %p1614_p2 = pnand %p1613_p7, %p1607_p12 }
  0x3e   : > { %1617 = shalt.err (!%p1614_p2)
}
  0x3f   : > { %s2625_s28 = smov 128   ;;  %s2627_s14 = smov 64  }
  0x40   : > { %s2629_s10 = smov 4   ;;  %p2656_p1 = scmp.lt.s32.totalorder %s1836_s6, 5 }
  0x41   : > { %1432 = dma.hbm_to_vmem [thread:$0]  (!%p2018_p11), %s2010_s4, 512, %s2012_s27, %s2024_s5, %s2625_s28, %s2627_s14, %s2629_s10  }
  0x42   : > { %p2657_p5 = scmp.ge.s32.totalorder %s1836_s6, 1  ;;  %s1308_s3 = sadd.s32 4294967294, %s1836_s6  }
  0x43   : > { %s45_s9 = sadd.s32 1, %s1816_s26  ;;  %p2659_p12 = scmp.eq.s32.totalorder %s1976_s13, 0 }
  0x44   : > { %p2059_p9 = pnand %p2657_p5, %p2656_p1  ;;  %p52_p13 = scmp.ne.s32.totalorder %s1816_s26, %s1812_s25 }
  0x45   : > { %s2068_s8 = scalar_select %p2659_p12, %s1816_s26, %s45_s9  }
  0x46   : > { %p58_p3 = scmp.ne.s32.totalorder %s1812_s25, %s1808_s24  ;;  %p194_p6 = scmp.eq.s32.totalorder %s1957_s7, 3 }
  0x47   : > { %2660 = sst [smem:[#allocation23_spill]] %s2068_s8  ;;  %p200_p0 = scmp.eq.s32.totalorder %s1308_s3, 3 }
  0x48   : > { %p2661_p4 = scmp.eq.s32.totalorder %s1836_s6, 0  ;;  %p2662_p7 = scmp.eq.s32.totalorder %s1957_s7, 0 }
  0x49   : > { %p2083_p2 = por %p194_p6, %p52_p13  ;;  %p2087_p1 = por %p200_p0, %p58_p3 }
  0x4a   : > { %p54_p10 = por %p2661_p4, %p52_p13  ;;  %p2079_p11 = por %p2662_p7, %p58_p3 }
  0x4b   : > { %s2664_s27 = scalar_select %p2083_p2, 1, 0 }
  0x4c   : > { %s2663_s4 = scalar_select %p2079_p11, 1, 0 }
  0x4d   : > { %s2665_s13 = scalar_select %p2087_p1, 1, 0 }
  0x4e   : > { %s226_s11 = sand.u32 1, %s1816_s26   ;;  %s235_s9 = sadd.s32 %s1828_s29, %s1314_s16 }
  0x4f   : > { %2666 = sst [smem:[#allocation24_spill]] %s2665_s13  ;;  %s1313_s28 = sshll.u32 %s226_s11, 5 }
  0x50   : > { %s1315_s3 = sshll.u32 %s235_s9, 6  ;;  %s2667_s0 = sld [smem:[#allocation25_spill]] }
  0x51   : > { %s230_s8 = scalar_lea.vmem [#allocation4], %s1313_s28  ;;  %p2668_p5 = scmp.lt.s32.totalorder %s1836_s6, 4 }
  0x52   : > { %s238_s17 = sshll.u32 %s230_s8, 4  ;;  %s2108_s16 = scalar_lea.sflag [#allocation5], %s226_s11  ;;  %s2100_s17 = int_to_ptr.vmem [resolvable:$true] %s238_s17 }
  0x53   : > { %p2104_p12 = pnand %p2668_p5, %p54_p10 }
  0x55   : > { %p1620_p3 = pneg %p2104_p12 }
  0x56   : > { %s2098_s1 = scalar_lea.hbm %s2667_s0, %s1315_s3  ;;  %s1623_s8 = scalar_lea.hbm %s2667_s0, 2048 }
  0x57   : > { %s1618_s14 = scalar_lea.hbm %s2098_s1, 512  ;;  %p1624_p4 = scmp.lt.u32.totalorder %s2098_s1, %s2667_s0 }
  0x58   : > { %p1619_p13 = scmp.ne.s32.totalorder %s2098_s1, %s1618_s14  ;;  %p1625_p10 = scmp.lt.u32.totalorder %s1623_s8, %s1618_s14 }
  0x59   : > { %p1627_p5 = scmp.lt.u32.totalorder %s1618_s14, %s2098_s1 }
  0x5a   : > { %p1621_p6 = pnand %p1620_p3, %p1619_p13  ;;  %p1626_p7 = por %p1625_p10, %p1624_p4 }
  0x5c   : > { %p1622_p0 = pneg %p1621_p6  ;;  %p1628_p1 = por %p1627_p5, %p1626_p7 }
  0x5e   : > { %p1629_p2 = pnand %p1628_p1, %p1622_p0 }
  0x60   : > { %1632 = shalt.err (!%p1629_p2)
}
  0x61   : > { %s1633_s11 = scalar_lea.vmem %s2100_s17, 512  ;;  %s1842_s28 = smov [#allocation4]  }
  0x62   : > { %p1634_p13 = scmp.ne.s32.totalorder %s2100_s17, %s1633_s11  ;;  %s1638_s10 = sshll.u32 %s1842_s28, 4  ;;  %s1639_s10 = int_to_ptr.vmem [resolvable:$false] %s1638_s10 }
  0x63   : > { %s1640_s9 = scalar_lea.vmem %s1639_s10, 1024  ;;  %p1641_p11 = scmp.lt.s32.totalorder %s2100_s17, %s1639_s10 }
  0x64   : > { %p1636_p6 = pnand %p1634_p13, %p1620_p3  ;;  %p1642_p4 = scmp.lt.s32.totalorder %s1640_s9, %s1633_s11 }
  0x66   : > { %p1637_p8 = pneg %p1636_p6  ;;  %p1643_p10 = por %p1642_p4, %p1641_p11 }
  0x68   : > { %p1644_p7 = pnand %p1643_p10, %p1637_p8 }
  0x6a   : > { %1647 = shalt.err (!%p1644_p7)
}
  0x6b   : > { %s2670_s14 = smov 4   ;;  %s2671_s8 = smov 64  }
  0x6c   : > { %s2672_s3 = smov 128   ;;  %s113_s26 = sadd.s32 1, %s1792_s20 }
  0x6d   : > { %1429 = dma.hbm_to_vmem [thread:$0]  (!%p2104_p12), %s2098_s1, 512, %s2100_s17, %s2108_s16, %s2672_s3, %s2671_s8, %s2670_s14  }
  0x6e   : > { %p120_p8 = scmp.ne.s32.totalorder %s1792_s20, %s1788_s19  ;;  %p126_p11 = scmp.ne.s32.totalorder %s1788_s19, %s1784_s18 }
  0x6f   : > { %s275_s11 = sand.u32 1, %s1792_s20   ;;  %p2673_p2 = scmp.eq.s32.totalorder %s1836_s6, 0 }
  0x70   : > { %p2674_p3 = scmp.eq.s32.totalorder %s1957_s7, 0  ;;  %s1320_s10 = sshll.u32 %s275_s11, 5 }
  0x71   : > { %p122_p1 = por %p120_p8, %p2673_p2  ;;  %s2676_s9 = sshll.u32 %s1832_s30, 10 }
  0x72   : > { %p2149_p0 = por %p126_p11, %p2674_p3  ;;  %s1780_s0 = sadd.s32 64, %s2676_s9 }
  0x73   : > { %s277_s29 = scalar_lea.vmem [#allocation9], %s1320_s10  ;;  %p2677_p5 = scmp.eq.s32.totalorder %s1973_s12, 0 }
  0x74   : > { %s2675_s28 = scalar_select %p2149_p0, 1, 0 }
  0x75   : > { %s288_s23 = sshll.u32 %s277_s29, 4  ;;  %s2163_s18 = scalar_lea.hbm %s2612_s2, %s1780_s0  ;;  %s2165_s23 = int_to_ptr.vmem [resolvable:$true] %s288_s23 }
  0x76   : > { %s2158_s13 = scalar_select %p2677_p5, %s1792_s20, %s113_s26  }
  0x77   : > { %p2678_p12 = scmp.lt.s32.totalorder %s1836_s6, 4  ;;  %s1648_s29 = scalar_lea.hbm %s2163_s18, 512 }
  0x78   : > { %p1649_p6 = scmp.ne.s32.totalorder %s2163_s18, %s1648_s29  ;;  %s1653_s26 = scalar_lea.hbm %s2612_s2, 2048 }
  0x79   : > { %p2169_p13 = pnand %p2678_p12, %p122_p1  ;;  %p1654_p8 = scmp.lt.u32.totalorder %s2163_s18, %s2612_s2 }
  0x7a   : > { %p1655_p11 = scmp.lt.u32.totalorder %s1653_s26, %s1648_s29  ;;  %p1657_p1 = scmp.lt.u32.totalorder %s1648_s29, %s2163_s18 }
  0x7b   : > { %p1650_p4 = pneg %p2169_p13 }
  0x7c   : > { %p1656_p2 = por %p1655_p11, %p1654_p8 }
  0x7d   : > { %p1651_p10 = pnand %p1650_p4, %p1649_p6 }
  0x7e   : > { %p1658_p3 = por %p1657_p1, %p1656_p2 }
  0x7f   : > { %p1652_p7 = pneg %p1651_p10 }
  0x81   : > { %p1659_p5 = pnand %p1658_p3, %p1652_p7 }
  0x83   : > { %1662 = shalt.err (!%p1659_p5)
}
  0x84   : > { %s1663_s9 = scalar_lea.vmem %s2165_s23, 512  ;;  %s1843_s1 = smov [#allocation9]  }
  0x85   : > { %p1664_p12 = scmp.ne.s32.totalorder %s2165_s23, %s1663_s9  ;;  %s1668_s17 = sshll.u32 %s1843_s1, 4  ;;  %s1669_s17 = int_to_ptr.vmem [resolvable:$false] %s1668_s17 }
  0x86   : > { %s1670_s0 = scalar_lea.vmem %s1669_s17, 1024  ;;  %p1671_p0 = scmp.lt.s32.totalorder %s2165_s23, %s1669_s17 }
  0x87   : > { %p1666_p6 = pnand %p1664_p12, %p1650_p4  ;;  %p1672_p8 = scmp.lt.s32.totalorder %s1670_s0, %s1663_s9 }
  0x89   : > { %p1667_p10 = pneg %p1666_p6  ;;  %p1673_p11 = por %p1672_p8, %p1671_p0 }
  0x8b   : > { %p1674_p2 = pnand %p1673_p11, %p1667_p10 }
  0x8d   : > { %1677 = shalt.err (!%p1674_p2)
}
  0x8e   : > { %1435 = dma.hbm_to_vmem [thread:$0]  (!%p2169_p13), %s2163_s18, 512, %s2165_s23, %s2024_s5, %s2672_s3, %s2671_s8, %s2670_s14  }
  0x8f   : > { %300 = sbr.rel (%p2059_p9) target bundleno = 787 (0x313), region = 40  ;;  %s2205_s29 = sand.u32 (!%p2059_p9), 1, %s1812_s25  }
  0x90   : > { %s1324_s12 = sshll.u32 (!%p2059_p9), %s2205_s29, 5  ;;  %s303_s26 = scalar_lea.sflag (!%p2059_p9), [#allocation5], %s2205_s29 }
  0x91   : > { %s2209_s11 = scalar_lea.vmem (!%p2059_p9), [#allocation4], %s1324_s12  ;;  %p2680_p0 = scmp.ne.s32.totalorder (!%p2059_p9), %s2663_s4, 0 }
  0x96   : > { %1763 = dma.done.wait (%p2680_p0), %s303_s26, 512  }
  0x97   : > { %1765 = vsyncadd (%p2680_p0), %s303_s26, 4294966784  ;;  %s311_s23 = sand.u32 1, %s1957_s7   ;;  %s313_s5 = sand.u32 1, %s1800_s22  }
  0x98   : > { %s1325_s21 = sshll.u32 %s313_s5, 5  ;;  %s312_s14 = scalar_lea.sflag [#allocation8], %s311_s23 }
  0x99   : > { %s2217_s8 = scalar_lea.vmem [#allocation7], %s1325_s21  ;;  %p2681_p9 = scmp.ne.s32.totalorder %s2652_s15, 0 }
  0x9b   : > { %1767 = dma.done.wait (%p2681_p9), %s312_s14, 512  }
  0x9c   : > { %1769 = vsyncadd (%p2681_p9), %s312_s14, 4294966784  ;;  %s322_s3 = sand.u32 1, %s1788_s19   ;;  %p2682_p13 = scmp.ne.s32.totalorder %s2675_s28, 0 }
  0x9d   : > { %s1326_s18 = sshll.u32 %s322_s3, 5 }
  0x9e   : > { %s2224_s4 = scalar_lea.vmem [#allocation9], %s1326_s18 }
  0x9f   : > { %1771 = dma.done.wait (%p2682_p13), %s312_s14, 512  }
  0xa0   : > { %1773 = vsyncadd (%p2682_p13), %s312_s14, 4294966784  ;;  %s1327_s7 = sshll.u32 %s2205_s29, 3  ;;  %vm368_vm0 = vcmask 917368   ;;  %vm373_vm1 = vcmask 138368   ;;  %v1844_v0 = vmov 0   ;;  %v1570_v1 = vld [vmem:[%s2209_s11] sm:$0xff]  }
  0xa1   : > { %369 = vst.msk [vmem:[#allocation2] sm:$0xff] %vm368_vm0, %v1844_v0  ;;  %370 = vst.msk [vmem:[#allocation2 + $0x18] sm:$0xff] %vm368_vm0, %v1844_v0  ;;  %v1571_v2 = vld [vmem:[%s2209_s11 + $0x8] sm:$0xff]   ;;  %v1572_v3 = vld [vmem:[%s2209_s11 + $0x10] sm:$0xff]   ;;  %s2235_s15 = scalar_lea.vmem [#allocation10], %s1327_s7  ;;  %s2683_s28 = sld [smem:[#allocation17_spill]] }
  0xa2   : > { %371 = vst.msk [vmem:[#allocation2 + $0x30] sm:$0xff] %vm368_vm0, %v1844_v0  ;;  %372 = vst.msk [vmem:[#allocation2 + $0x48] sm:$0xff] %vm368_vm0, %v1844_v0  ;;  %v1573_v4 = vld [vmem:[%s2209_s11 + $0x18] sm:$0xff]  }
  0xa3   : > { %374 = vst.msk [vmem:[#allocation2 + $0x10] sm:$0xff] %vm373_vm1, %v1844_v0  ;;  %375 = vst.msk [vmem:[#allocation2 + $0x28] sm:$0xff] %vm373_vm1, %v1844_v0 }
  0xa4   : > { %376 = vst.msk [vmem:[#allocation2 + $0x40] sm:$0xff] %vm373_vm1, %v1844_v0  ;;  %377 = vst.msk [vmem:[#allocation2 + $0x58] sm:$0xff] %vm373_vm1, %v1844_v0 }
  0xa5   : > { %410 = vst [vmem:[#allocation2 + $0x8] sm:$0xff] %v1570_v1  ;;  %411 = vst [vmem:[#allocation2 + $0x20] sm:$0xff] %v1571_v2 }
  0xa6   : > { %412 = vst [vmem:[#allocation2 + $0x38] sm:$0xff] %v1572_v3  ;;  %413 = vst [vmem:[#allocation2 + $0x50] sm:$0xff] %v1573_v4 }
  0xa7   : > { %p1332_p4 = scmp.le.s32.totalorder %s2683_s28, 0 }
  0xa8   : > { %v1574_v5 = vld [vmem:[%s2217_s8] sm:$0xff] (!%p1332_p4)   ;;  %vm450_vm2 = vcmask (!%p1332_p4), 1048448   ;;  %v1575_v6 = vld [vmem:[%s2217_s8 + $0x8] sm:$0xff] (!%p1332_p4)   ;;  %v1576_v7 = vld [vmem:[%s2217_s8 + $0x10] sm:$0xff] (!%p1332_p4)  }
  0xa9   : > { %417 = sbr.rel (%p1332_p4) target bundleno = 176 (0xb0), region = 56  ;;  %451 = vst.msk [vmem:[#allocation2] sm:$0xff] (!%p1332_p4), %vm450_vm2, %v1574_v5  ;;  %452 = vst.msk [vmem:[#allocation2 + $0x18] sm:$0xff] (!%p1332_p4), %vm450_vm2, %v1575_v6  ;;  %v1577_v8 = vld [vmem:[%s2217_s8 + $0x18] sm:$0xff] (!%p1332_p4)  }
  0xaa   : > { %453 = vst.msk [vmem:[#allocation2 + $0x30] sm:$0xff] (!%p1332_p4), %vm450_vm2, %v1576_v7  ;;  %454 = vst.msk [vmem:[#allocation2 + $0x48] sm:$0xff] (!%p1332_p4), %vm450_vm2, %v1577_v8 }
  0xb0 PF: > { %s2684_s16 = sld [smem:[#allocation17_spill]] }
  0xb6   : > { %p1337_p7 = scmp.ne.s32.totalorder %s2684_s16, 0 }
  0xb7   : > { %vm459_vm3 = vcmask (!%p1337_p7), 1048448   ;;  %v1845_v9 = vmov (!%p1337_p7), 0  }
  0xb8   : > { %458 = sbr.rel (%p1337_p7) target bundleno = 191 (0xbf), region = 60  ;;  %460 = vst.msk [vmem:[#allocation2] sm:$0xff] (!%p1337_p7), %vm459_vm3, %v1845_v9  ;;  %461 = vst.msk [vmem:[#allocation2 + $0x18] sm:$0xff] (!%p1337_p7), %vm459_vm3, %v1845_v9 }
  0xb9   : > { %462 = vst.msk [vmem:[#allocation2 + $0x30] sm:$0xff] (!%p1337_p7), %vm459_vm3, %v1845_v9  ;;  %463 = vst.msk [vmem:[#allocation2 + $0x48] sm:$0xff] (!%p1337_p7), %vm459_vm3, %v1845_v9 }
  0xbf PF: > { %s2685_s10 = sld [smem:[#allocation17_spill]] }
  0xc5   : > { %p1338_p1 = scmp.ge.s32.totalorder %s2685_s10, 1 }
  0xc6   : > { %v1578_v10 = vld [vmem:[%s2224_s4] sm:$0xff] (!%p1338_p1)   ;;  %vm500_vm4 = vcmask (!%p1338_p1), 130048   ;;  %v1579_v11 = vld [vmem:[%s2224_s4 + $0x8] sm:$0xff] (!%p1338_p1)   ;;  %v1580_v12 = vld [vmem:[%s2224_s4 + $0x10] sm:$0xff] (!%p1338_p1)  }
  0xc7   : > { %467 = sbr.rel (%p1338_p1) target bundleno = 206 (0xce), region = 64  ;;  %501 = vst.msk [vmem:[#allocation2 + $0x10] sm:$0xff] (!%p1338_p1), %vm500_vm4, %v1578_v10  ;;  %502 = vst.msk [vmem:[#allocation2 + $0x28] sm:$0xff] (!%p1338_p1), %vm500_vm4, %v1579_v11  ;;  %v1581_v13 = vld [vmem:[%s2224_s4 + $0x18] sm:$0xff] (!%p1338_p1)  }
  0xc8   : > { %503 = vst.msk [vmem:[#allocation2 + $0x40] sm:$0xff] (!%p1338_p1), %vm500_vm4, %v1580_v12  ;;  %504 = vst.msk [vmem:[#allocation2 + $0x58] sm:$0xff] (!%p1338_p1), %vm500_vm4, %v1581_v13 }
  0xce PF: > { %s2686_s9 = sld [smem:[#allocation17_spill]] }
  0xd4   : > { %p1343_p3 = scmp.ne.s32.totalorder %s2686_s9, 1 }
  0xd5   : > { %vm509_vm5 = vcmask (!%p1343_p3), 130048   ;;  %v1846_v14 = vmov (!%p1343_p3), 0  }
  0xd6   : > { %508 = sbr.rel (%p1343_p3) target bundleno = 221 (0xdd), region = 68  ;;  %510 = vst.msk [vmem:[#allocation2 + $0x10] sm:$0xff] (!%p1343_p3), %vm509_vm5, %v1846_v14  ;;  %511 = vst.msk [vmem:[#allocation2 + $0x28] sm:$0xff] (!%p1343_p3), %vm509_vm5, %v1846_v14 }
  0xd7   : > { %512 = vst.msk [vmem:[#allocation2 + $0x40] sm:$0xff] (!%p1343_p3), %vm509_vm5, %v1846_v14  ;;  %513 = vst.msk [vmem:[#allocation2 + $0x58] sm:$0xff] (!%p1343_p3), %vm509_vm5, %v1846_v14 }
  0xdd PF: > { %v514_v15 = vlaneseq  ;;  %1582 = vset.pattern.permute.xlu0 %v1844_v0  ;;  %v1847_v18 = vmov 0.0   ;;  %s1848_s1 = smov 113   ;;  %s1849_s17 = smov 15   ;;  %v2257_v23 = vld [vmem:[#allocation2 + $0x8] sm:$0xff]  ;;  %v2259_v24 = vld [vmem:[#allocation2] sm:$0xff]  ;;  %v2265_v26 = vld [vmem:[#allocation2 + $0x18] sm:$0xff] }
  0xde   : > { %s1850_s0 = smov 111   ;;  %s1851_s12 = smov 127   ;;  %v2263_v25 = vld [vmem:[#allocation2 + $0x20] sm:$0xff]  ;;  %v2269_v27 = vld [vmem:[#allocation2 + $0x38] sm:$0xff]  ;;  %v2271_v28 = vld [vmem:[#allocation2 + $0x30] sm:$0xff]  ;;  %vm625_vm8 = vcmask 130048  }
  0xdf   : > { %v515_v16 = vand.u32 127, %v514_v15  ;;  %s1852_s26 = smov 1   ;;  %s1853_s11 = smov 17   ;;  %v2275_v29 = vld [vmem:[#allocation2 + $0x10] sm:$0xff]  ;;  %v2281_v31 = vld [vmem:[#allocation2 + $0x48] sm:$0xff]  ;;  %v2289_v33 = vld [vmem:[#allocation2 + $0x40] sm:$0xff] }
  0xe0   : > { %s1854_s23 = smov 16   ;;  %s1855_s5 = smov 112   ;;  %v2279_v30 = vld [vmem:[#allocation2 + $0x50] sm:$0xff]  ;;  %v2285_v32 = vld [vmem:[#allocation2 + $0x28] sm:$0xff]  ;;  %v2293_v34 = vld [vmem:[#allocation2 + $0x58] sm:$0xff]  ;;  %vm903_vm9 = vcmask 916480  }
  0xe1   : > { %v520_v17 = vand.u32 15, %v515_v16  ;;  %s2687_s8 = sld [smem:[#allocation27_spill]]  ;;  %s2688_s28 = sld [smem:[#allocation28_spill]]  ;;  %vm682_vm10 = vcmask 121856   ;;  %vm580_vm11 = vcmask 138240   ;;  %vm858_vm12 = vcmask 924672  }
  0xe2   : > { %vm738_vm13 = vcmask 7168   ;;  %vm802_vm14 = vcmask 1039360   ;;  %vm1856_vm15 = vmmov 0   ;;  %vm959_vm0 = vcmask 908288   ;;  %s2689_s16 = sld [smem:[#allocation18_spill]]  ;;  %s1160_s14 = scalar_lea.sflag [#allocation6], %s2205_s29 }
  0xe3   : > { %vm532_vm6 = vcmp.le.s32.totalorder %v520_v17, 14  ;;  %vm528_vm7 = vcmp.ge.s32.totalorder %v520_v17, 1  ;;  %vm1034_vm1 = vcmask 523264   ;;  %p2692_p12 = scmp.ne.s32.totalorder %s2664_s27, 0  ;;  %s1857_s18 = smov [#allocation10]  }
  0xe4   : > { %v1345_v19 = vsel %vm532_vm6, 1.0, %v1847_v18  ;;  %v1344_v20 = vsel %vm528_vm7, 1.0, %v1847_v18  ;;  %s1682_s4 = sshll.u32 %s1857_s18, 4  ;;  %s1683_s4 = int_to_ptr.vmem [resolvable:$false] %s1682_s4 }
  0xe5   : > { %v535_v21 = vpack.c.bf16 %v1345_v19, %v1345_v19  ;;  %v531_v22 = vpack.c.bf16 %v1344_v20, %v1344_v20  ;;  %s1684_s7 = scalar_lea.vmem %s1683_s4, 256 }
  0xe7   : > { %647 = vrot.lane.b32.xlu0 %v535_v21, %s1848_s1  ;;  %823 = vrot.lane.b32.xlu1 %v531_v22, %s1849_s17 }
  0xeb   : > { %545 = vrot.lane.b32.xlu0 %v531_v22, %s1850_s0  ;;  %703 = vrot.lane.b32.xlu1 %v531_v22, %s1851_s12 }
  0xef   : > { %767 = vrot.lane.b32.xlu0 %v535_v21, %s1852_s26  ;;  %924 = vrot.lane.b32.xlu1 %v535_v21, %s1853_s11 }
  0xf3   : > { %611 = vrot.lane.b32.xlu1 %v2257_v23, %s1854_s23  ;;  %609 = vrot.lane.b32.xlu0 %v2259_v24, %s1854_s23 }
  0xf7   : > { %615 = vrot.lane.b32.xlu1 %v2263_v25, %s1854_s23  ;;  %613 = vrot.lane.b32.xlu0 %v2265_v26, %s1854_s23 }
  0xfb   : > { %619 = vrot.lane.b32.xlu1 %v2269_v27, %s1854_s23  ;;  %617 = vrot.lane.b32.xlu0 %v2271_v28, %s1854_s23 }
  0xff   : > { %889 = vrot.lane.b32.xlu1 %v2275_v29, %s1855_s5  ;;  %887 = vrot.lane.b32.xlu0 %v2257_v23, %s1855_s5 }
 0x103   : > { %623 = vrot.lane.b32.xlu1 %v2279_v30, %s1854_s23  ;;  %621 = vrot.lane.b32.xlu0 %v2281_v31, %s1854_s23 }
 0x107   : > { %893 = vrot.lane.b32.xlu1 %v2285_v32, %s1855_s5  ;;  %891 = vrot.lane.b32.xlu0 %v2263_v25, %s1855_s5 }
 0x10b   : > { %897 = vrot.lane.b32.xlu1 %v2289_v33, %s1855_s5  ;;  %895 = vrot.lane.b32.xlu0 %v2269_v27, %s1855_s5 }
 0x10f   : > { %901 = vrot.lane.b32.xlu1 %v2293_v34, %s1855_s5  ;;  %899 = vrot.lane.b32.xlu0 %v2279_v30, %s1855_s5  ;;  %s2691_s5 = sld [smem:[#allocation29_spill]] }
 0x159   : > { %v648_v35 = vpop.permute.xlu0 %647  ;;  %v2297_v36 = vpop.permute.xlu1 %823 }
 0x15a   : > { %v651_v37 = vmul.bf16 %v648_v35, %v2257_v23  ;;  %v650_v38 = vmul.bf16 %v648_v35, %v2259_v24  ;;  %v653_v45 = vmul.bf16 %v648_v35, %v2263_v25  ;;  %v652_v46 = vmul.bf16 %v648_v35, %v2265_v26 }
 0x15b   : > { %v655_v54 = vmul.bf16 %v648_v35, %v2269_v27  ;;  %v654_v55 = vmul.bf16 %v648_v35, %v2271_v28  ;;  %v827_v62 = vmul.bf16 %v2275_v29, %v2297_v36  ;;  %v826_v63 = vmul.bf16 %v2297_v36, %v2257_v23 }
 0x15c   : > { %668 = vrot.lane.b32.xlu1 %v651_v37, %s1849_s17  ;;  %666 = vrot.lane.b32.xlu0 %v650_v38, %s1849_s17  ;;  %v657_v5 = vmul.bf16 %v648_v35, %v2279_v30  ;;  %v656_v6 = vmul.bf16 %v648_v35, %v2281_v31  ;;  %v829_v15 = vmul.bf16 %v2285_v32, %v2297_v36 }
 0x15d   : > { %v546_v39 = vpop.permute.xlu0 %545  ;;  %v2303_v40 = vpop.permute.xlu1 %703  ;;  %v828_v16 = vmul.bf16 %v2297_v36, %v2263_v25  ;;  %v831_v21 = vmul.bf16 %v2289_v33, %v2297_v36  ;;  %v830_v22 = vmul.bf16 %v2297_v36, %v2269_v27  ;;  %v833_v37 = vmul.bf16 %v2293_v34, %v2297_v36 }
 0x15e   : > { %v549_v41 = vmul.bf16 %v2257_v23, %v546_v39  ;;  %v548_v42 = vmul.bf16 %v2259_v24, %v546_v39  ;;  %v551_v49 = vmul.bf16 %v2263_v25, %v546_v39  ;;  %v550_v50 = vmul.bf16 %v2265_v26, %v546_v39 }
 0x15f   : > { %v553_v59 = vmul.bf16 %v2269_v27, %v546_v39  ;;  %v552_v60 = vmul.bf16 %v2271_v28, %v546_v39  ;;  %v555_v10 = vmul.bf16 %v2279_v30, %v546_v39  ;;  %v554_v11 = vmul.bf16 %v2281_v31, %v546_v39 }
 0x160   : > { %566 = vrot.lane.b32.xlu1 %v549_v41, %s1853_s11  ;;  %564 = vrot.lane.b32.xlu0 %v548_v42, %s1853_s11  ;;  %v707_v19 = vmul.bf16 %v2303_v40, %v2257_v23  ;;  %v706_v20 = vmul.bf16 %v2303_v40, %v2259_v24  ;;  %v709_v35 = vmul.bf16 %v2303_v40, %v2263_v25  ;;  %v2407_v42 = vld [vmem:[%s2687_s8] sm:$0xff] }
 0x161   : > { %v2309_v43 = vpop.permute.xlu0 %767  ;;  %v2311_v44 = vpop.permute.xlu1 %924  ;;  %v708_v24 = vmul.bf16 %v2303_v40, %v2265_v26  ;;  %v832_v38 = vmul.bf16 %v2297_v36, %v2279_v30  ;;  %v711_v39 = vmul.bf16 %v2303_v40, %v2269_v27  ;;  %v710_v26 = vmul.bf16 %v2303_v40, %v2271_v28 }
 0x162   : > { %v713_v41 = vmul.bf16 %v2303_v40, %v2279_v30  ;;  %v712_v36 = vmul.bf16 %v2303_v40, %v2281_v31  ;;  %v771_v28 = vmul.bf16 %v2275_v29, %v2309_v43  ;;  %v773_v31 = vmul.bf16 %v2285_v32, %v2309_v43 }
 0x163   : > { %v772_v40 = vmul.bf16 %v2309_v43, %v2263_v25 }
 0x164   : > { %672 = vrot.lane.b32.xlu1 %v653_v45, %s1849_s17  ;;  %670 = vrot.lane.b32.xlu0 %v652_v46, %s1849_s17  ;;  %v1347_v45 = vcombine.high %v2407_v42, %v2407_v42  ;;  %v770_v46 = vmul.bf16 %v2309_v43, %v2257_v23 }
 0x165   : > { %v612_v47 = vpop.permute.xlu1 %611  ;;  %v610_v48 = vpop.permute.xlu0 %609 }
 0x166   : > { %v2320_v51 = vsel %vm625_vm8, %v610_v48, %v612_v47  ;;  %1070 = vmatprep.mubr.bf16.mxu0 %v1347_v45  ;;  %v928_v47 = vmul.bf16 %v2311_v44, %v2275_v29  ;;  %v927_v48 = vmul.bf16 %v2311_v44, %v2257_v23  ;;  %v774_v29 = vmul.bf16 %v2309_v43, %v2269_v27 }
 0x168   : > { %570 = vrot.lane.b32.xlu1 %v551_v49, %s1853_s11  ;;  %568 = vrot.lane.b32.xlu0 %v550_v50, %s1853_s11  ;;  %v2434_v49 = vld [vmem:[%s2687_s8 + $0x8] sm:$0xff] }
 0x169   : > { %v616_v52 = vpop.permute.xlu1 %615  ;;  %v614_v53 = vpop.permute.xlu0 %613  ;;  %v1349_v50 = vcombine.high %v2434_v49, %v2434_v49 }
 0x16a   : > { %v2327_v56 = vsel %vm625_vm8, %v614_v53, %v616_v52  ;;  %v775_v52 = vmul.bf16 %v2289_v33, %v2309_v43  ;;  %v930_v53 = vmul.bf16 %v2311_v44, %v2285_v32  ;;  %v932_v32 = vmul.bf16 %v2311_v44, %v2289_v33  ;;  %v1011_v33 = vld [vmem:[%s2688_s28] sm:$0xff] }
 0x16b   : > { %1110 = vmatprep.mubr.bf16.mxu1 %v1349_v50 }
 0x16c   : > { %676 = vrot.lane.b32.xlu1 %v655_v54, %s1849_s17  ;;  %674 = vrot.lane.b32.xlu0 %v654_v55, %s1849_s17  ;;  %v929_v54 = vmul.bf16 %v2311_v44, %v2263_v25  ;;  %v777_v55 = vmul.bf16 %v2293_v34, %v2309_v43 }
 0x16d   : > { %v620_v57 = vpop.permute.xlu1 %619  ;;  %v618_v58 = vpop.permute.xlu0 %617 }
 0x16e   : > { %v2334_v61 = vsel %vm625_vm8, %v618_v58, %v620_v57  ;;  %v776_v57 = vmul.bf16 %v2309_v43, %v2279_v30  ;;  %v931_v58 = vmul.bf16 %v2311_v44, %v2269_v27  ;;  %v933_v43 = vmul.bf16 %v2311_v44, %v2279_v30 }
 0x170   : > { %574 = vrot.lane.b32.xlu1 %v553_v59, %s1853_s11  ;;  %572 = vrot.lane.b32.xlu0 %v552_v60, %s1853_s11  ;;  %v934_v59 = vmul.bf16 %v2311_v44, %v2293_v34 }
 0x171   : > { %v890_v0 = vpop.permute.xlu1 %889  ;;  %v888_v1 = vpop.permute.xlu0 %887 }
 0x172   : > { %v2343_v2 = vsel %vm903_vm9, %v888_v1, %v890_v0 }
 0x174   : > { %844 = vrot.lane.b32.xlu1 %v827_v62, %s1848_s1  ;;  %842 = vrot.lane.b32.xlu0 %v826_v63, %s1848_s1 }
 0x175   : > { %v624_v3 = vpop.permute.xlu1 %623  ;;  %v622_v4 = vpop.permute.xlu0 %621 }
 0x176   : > { %v2350_v7 = vsel %vm625_vm8, %v622_v4, %v624_v3 }
 0x178   : > { %680 = vrot.lane.b32.xlu1 %v657_v5, %s1849_s17  ;;  %678 = vrot.lane.b32.xlu0 %v656_v6, %s1849_s17  ;;  %s1353_s17 = sshll.u32 %s2689_s16, 1 }
 0x179   : > { %v894_v8 = vpop.permute.xlu1 %893  ;;  %v892_v9 = vpop.permute.xlu0 %891 }
 0x17a   : > { %v2357_v12 = vsel %vm903_vm9, %v892_v9, %v894_v8 }
 0x17c   : > { %578 = vrot.lane.b32.xlu1 %v555_v10, %s1853_s11  ;;  %576 = vrot.lane.b32.xlu0 %v554_v11, %s1853_s11 }
 0x17d   : > { %v898_v13 = vpop.permute.xlu1 %897  ;;  %v896_v14 = vpop.permute.xlu0 %895 }
 0x17e   : > { %v2366_v17 = vsel %vm903_vm9, %v896_v14, %v898_v13 }
 0x180   : > { %848 = vrot.lane.b32.xlu1 %v829_v15, %s1848_s1  ;;  %846 = vrot.lane.b32.xlu0 %v828_v16, %s1848_s1 }
 0x181   : > { %v2471_v60 = vpop.permute.xlu1 %901  ;;  %v2473_v62 = vpop.permute.xlu0 %899 }
 0x184   : > { %724 = vrot.lane.b32.xlu1 %v707_v19, %s1852_s26  ;;  %722 = vrot.lane.b32.xlu0 %v706_v20, %s1852_s26 }
 0x188   : > { %852 = vrot.lane.b32.xlu1 %v831_v21, %s1848_s1  ;;  %850 = vrot.lane.b32.xlu0 %v830_v22, %s1848_s1 }
 0x18c   : > { %728 = vrot.lane.b32.xlu1 %v709_v35, %s1852_s26  ;;  %726 = vrot.lane.b32.xlu0 %v708_v24, %s1852_s26 }
 0x190   : > { %856 = vrot.lane.b32.xlu1 %v833_v37, %s1848_s1  ;;  %854 = vrot.lane.b32.xlu0 %v832_v38, %s1848_s1  ;;  %s2690_s1 = sld [smem:[#allocation17_spill]] }
 0x194   : > { %732 = vrot.lane.b32.xlu1 %v711_v39, %s1852_s26  ;;  %730 = vrot.lane.b32.xlu0 %v710_v26, %s1852_s26 }
 0x198   : > { %736 = vrot.lane.b32.xlu1 %v713_v41, %s1852_s26  ;;  %734 = vrot.lane.b32.xlu0 %v712_v36, %s1852_s26  ;;  %s1175_s26 = sshll.u32 %s2235_s15, 4  ;;  %s2533_s26 = int_to_ptr.vmem [resolvable:$true] %s1175_s26 }
 0x199   : > { %s1678_s3 = scalar_lea.vmem %s2533_s26, 128  ;;  %p1685_p8 = scmp.lt.s32.totalorder %s2533_s26, %s1683_s4 }
 0x19a   : > { %p1679_p5 = scmp.ne.s32.totalorder %s2533_s26, %s1678_s3  ;;  %p1686_p11 = scmp.lt.s32.totalorder %s1684_s7, %s1678_s3 }
 0x19c   : > { %788 = vrot.lane.b32.xlu1 %v771_v28, %s1851_s12  ;;  %786 = vrot.lane.b32.xlu0 %v770_v46, %s1851_s12  ;;  %p1680_p6 = pnand %p1679_p5, %p2692_p12  ;;  %p1687_p2 = por %p1686_p11, %p1685_p8 }
 0x19e   : > { %p1681_p10 = pneg %p1680_p6 }
 0x1a0   : > { %792 = vrot.lane.b32.xlu1 %v773_v31, %s1851_s12  ;;  %790 = vrot.lane.b32.xlu0 %v772_v40, %s1851_s12  ;;  %p1688_p0 = pnand %p1687_p2, %p1681_p10 }
 0x1a4   : > { %945 = vrot.lane.b32.xlu1 %v928_v47, %s1850_s0  ;;  %943 = vrot.lane.b32.xlu0 %v927_v48, %s1850_s0 }
 0x1a8   : > { %796 = vrot.lane.b32.xlu1 %v775_v52, %s1851_s12  ;;  %794 = vrot.lane.b32.xlu0 %v774_v29, %s1851_s12 }
 0x1ac   : > { %949 = vrot.lane.b32.xlu1 %v930_v53, %s1850_s0  ;;  %947 = vrot.lane.b32.xlu0 %v929_v54, %s1850_s0 }
 0x1b0   : > { %800 = vrot.lane.b32.xlu1 %v777_v55, %s1851_s12  ;;  %798 = vrot.lane.b32.xlu0 %v776_v57, %s1851_s12 }
 0x1b4   : > { %953 = vrot.lane.b32.xlu1 %v932_v32, %s1850_s0  ;;  %951 = vrot.lane.b32.xlu0 %v931_v58, %s1850_s0  ;;  %v1346_v32 = vcombine.low %v2407_v42, %v2407_v42 }
 0x1b8   : > { %957 = vrot.lane.b32.xlu1 %v934_v59, %s1850_s0  ;;  %955 = vrot.lane.b32.xlu0 %v933_v43, %s1850_s0  ;;  %s1171_s0 = sadd.s32 %s2690_s1, %s1353_s17 }
 0x1b9   : > { %s1354_s12 = sshll.u32 %s1171_s0, 7 }
 0x1ba   : > { %s2531_s21 = scalar_lea.hbm %s2691_s5, %s1354_s12 }
 0x1bc   : > { %1014 = vperm.xlu0 %1582, %v1011_v33  }
 0x1ce   : > { %v669_v63 = vpop.permute.xlu1 %668  ;;  %v667_v0 = vpop.permute.xlu0 %666 }
 0x1cf   : > { %v683_v34 = vsel %vm682_vm10, %v667_v0, %v669_v63 }
 0x1d0   : > { %1357 = vmatprep.subr.bf16.mxu0 %v683_v34  ;;  %v907_v34 = vsel %vm903_vm9, %v2473_v62, %v2471_v60 }
 0x1d2   : > { %v567_v44 = vpop.permute.xlu1 %566  ;;  %v565_v1 = vpop.permute.xlu0 %564 }
 0x1d3   : > { %v581_v3 = vsel %vm580_vm11, %v565_v1, %v567_v44 }
 0x1d4   : > { %1358 = vmatpush3.bf16.msra.mxu0 %v581_v3 }
 0x1d6   : > { %v673_v4 = vpop.permute.xlu1 %672  ;;  %v671_v5 = vpop.permute.xlu0 %670 }
 0x1d7   : > { %v684_v6 = vsel %vm682_vm10, %v671_v5, %v673_v4 }
 0x1d8   : > { %1359 = vmatprep.subr.bf16.mxu0 %v684_v6  ;;  %v1348_v6 = vcombine.low %v2434_v49, %v2434_v49 }
 0x1da   : > { %v571_v8 = vpop.permute.xlu1 %570  ;;  %v569_v9 = vpop.permute.xlu0 %568 }
 0x1db   : > { %v582_v10 = vsel %vm580_vm11, %v569_v9, %v571_v8 }
 0x1dc   : > { %1360 = vmatpush3.bf16.msra.mxu0 %v582_v10 }
 0x1de   : > { %v677_v11 = vpop.permute.xlu1 %676  ;;  %v675_v13 = vpop.permute.xlu0 %674 }
 0x1df   : > { %v685_v14 = vsel %vm682_vm10, %v675_v13, %v677_v11  ;;  %v1587_v13 = vld [vmem:[%s2687_s8 + $0x10] ss:$0 sps:$4 sm:$0xff]  }
 0x1e0   : > { %1361 = vmatprep.subr.bf16.mxu0 %v685_v14 }
 0x1e2   : > { %v575_v15 = vpop.permute.xlu1 %574  ;;  %v573_v16 = vpop.permute.xlu0 %572 }
 0x1e3   : > { %v583_v19 = vsel %vm580_vm11, %v573_v16, %v575_v15 }
 0x1e4   : > { %1362 = vmatpush3.bf16.msra.mxu0 %v583_v19 }
 0x1e6   : > { %v845_v20 = vpop.permute.xlu1 %844  ;;  %v843_v21 = vpop.permute.xlu0 %842 }
 0x1e7   : > { %v859_v22 = vsel %vm858_vm12, %v843_v21, %v845_v20 }
 0x1e8   : > { %1379 = vmatprep.subr.bf16.mxu1 %v859_v22 }
 0x1e9   : > { %1380 = vmatpush3.bf16.msra.mxu1 %v2257_v23 }
 0x1ea   : > { %v681_v35 = vpop.permute.xlu1 %680  ;;  %v679_v24 = vpop.permute.xlu0 %678 }
 0x1eb   : > { %v686_v37 = vsel %vm682_vm10, %v679_v24, %v681_v35 }
 0x1ec   : > { %1363 = vmatprep.subr.bf16.mxu0 %v686_v37 }
 0x1ee   : > { %v579_v38 = vpop.permute.xlu1 %578  ;;  %v577_v39 = vpop.permute.xlu0 %576 }
 0x1ef   : > { %v584_v26 = vsel %vm580_vm11, %v577_v39, %v579_v38 }
 0x1f0   : > { %1364 = vmatpush3.bf16.msra.mxu0 %v584_v26 }
 0x1f2   : > { %v849_v41 = vpop.permute.xlu1 %848  ;;  %v847_v36 = vpop.permute.xlu0 %846 }
 0x1f3   : > { %v860_v45 = vsel %vm858_vm12, %v847_v36, %v849_v41 }
 0x1f4   : > { %1381 = vmatprep.subr.bf16.mxu1 %v860_v45 }
 0x1f5   : > { %1382 = vmatpush3.bf16.msra.mxu1 %v2263_v25 }
 0x1f6   : > { %v725_v28 = vpop.permute.xlu1 %724  ;;  %v723_v23 = vpop.permute.xlu0 %722 }
 0x1f7   : > { %v739_v46 = vsel %vm738_vm13, %v723_v23, %v725_v28 }
 0x1f8   : > { %1365 = vmatprep.subr.bf16.mxu0 %v739_v46 }
 0x1f9   : > { %1366 = vmatpush3.bf16.msra.mxu0 %v2320_v51 }
 0x1fa   : > { %v853_v31 = vpop.permute.xlu1 %852  ;;  %v851_v40 = vpop.permute.xlu0 %850 }
 0x1fb   : > { %v861_v47 = vsel %vm858_vm12, %v851_v40, %v853_v31 }
 0x1fc   : > { %1383 = vmatprep.subr.bf16.mxu1 %v861_v47 }
 0x1fd   : > { %1384 = vmatpush3.bf16.msra.mxu1 %v2269_v27 }
 0x1fe   : > { %v729_v48 = vpop.permute.xlu1 %728  ;;  %v727_v50 = vpop.permute.xlu0 %726 }
 0x1ff   : > { %v740_v52 = vsel %vm738_vm13, %v727_v50, %v729_v48 }
 0x200   : > { %1367 = vmatprep.subr.bf16.mxu0 %v740_v52 }
 0x201   : > { %1368 = vmatpush3.bf16.msra.mxu0 %v2327_v56 }
 0x202   : > { %v857_v25 = vpop.permute.xlu1 %856  ;;  %v855_v29 = vpop.permute.xlu0 %854 }
 0x203   : > { %v862_v53 = vsel %vm858_vm12, %v855_v29, %v857_v25 }
 0x204   : > { %1385 = vmatprep.subr.bf16.mxu1 %v862_v53 }
 0x205   : > { %1386 = vmatpush3.bf16.msra.mxu1 %v2279_v30 }
 0x206   : > { %v733_v51 = vpop.permute.xlu1 %732  ;;  %1387 = vmatprep.subr.bf16.mxu1 %v2343_v2  ;;  %v731_v54 = vpop.permute.xlu0 %730 }
 0x207   : > { %v741_v27 = vsel %vm738_vm13, %v731_v54, %v733_v51 }
 0x208   : > { %1369 = vmatprep.subr.bf16.mxu0 %v741_v27 }
 0x209   : > { %1370 = vmatpush3.bf16.msra.mxu0 %v2334_v61 }
 0x20a   : > { %v737_v55 = vpop.permute.xlu1 %736  ;;  %v735_v57 = vpop.permute.xlu0 %734 }
 0x20b   : > { %v742_v56 = vsel %vm738_vm13, %v735_v57, %v737_v55 }
 0x20c   : > { %1371 = vmatprep.subr.bf16.mxu0 %v742_v56 }
 0x20d   : > { %1372 = vmatpush3.bf16.msra.mxu0 %v2350_v7 }
 0x20e   : > { %v789_v30 = vpop.permute.xlu1 %788  ;;  %v787_v58 = vpop.permute.xlu0 %786  ;;  %1406 = vmatprep.subr.bf16.mxu0 %v1847_v18 }
 0x20f   : > { %v803_v2 = vsel %vm802_vm14, %v787_v58, %v789_v30 }
 0x210   : > { %1388 = vmatpush3.bf16.msra.mxu1 %v803_v2  ;;  %1071 = vmatmul.mubr.bf16.vlgmr.msra.gmra.mrb[0].mxu0 %v1346_v32 }
 0x211   : > { %1389 = vmatprep.subr.bf16.mxu1 %v2357_v12  ;;  %1414 = vmatprep.mubr.msk.bf16.mxu0 %vm1856_vm15, %v1847_v18 }
 0x212   : > { %v793_v61 = vpop.permute.xlu1 %792  ;;  %v791_v59 = vpop.permute.xlu0 %790 }
 0x213   : > { %v804_v43 = vsel %vm802_vm14, %v791_v59, %v793_v61 }
 0x214   : > { %1390 = vmatpush3.bf16.msra.mxu1 %v804_v43 }
 0x215   : > { %1391 = vmatprep.subr.bf16.mxu1 %v2366_v17 }
 0x216   : > { %v946_v7 = vpop.permute.xlu1 %945  ;;  %v944_v42 = vpop.permute.xlu0 %943 }
 0x217   : > { %v960_v33 = vsel %vm959_vm0, %v944_v42, %v946_v7 }
 0x218   : > { %1407 = vmatpush3.bf16.msra.mxu0 %v960_v33 }
 0x219   : > { %1408 = vmatprep.subr.bf16.mxu0 %v1847_v18 }
 0x21a   : > { %v797_v63 = vpop.permute.xlu1 %796  ;;  %v795_v12 = vpop.permute.xlu0 %794 }
 0x21b   : > { %v805_v0 = vsel %vm802_vm14, %v795_v12, %v797_v63 }
 0x21c   : > { %1392 = vmatpush3.bf16.msra.mxu1 %v805_v0 }
 0x21d   : > { %1393 = vmatprep.subr.bf16.mxu1 %v907_v34 }
 0x21e   : > { %v950_v44 = vpop.permute.xlu1 %949  ;;  %v948_v1 = vpop.permute.xlu0 %947 }
 0x21f   : > { %v961_v17 = vsel %vm959_vm0, %v948_v1, %v950_v44 }
 0x220   : > { %1409 = vmatpush3.bf16.msra.mxu0 %v961_v17 }
 0x221   : > { %1410 = vmatprep.subr.bf16.mxu0 %v1847_v18 }
 0x222   : > { %v801_v3 = vpop.permute.xlu1 %800  ;;  %v799_v4 = vpop.permute.xlu0 %798 }
 0x223   : > { %v806_v5 = vsel %vm802_vm14, %v799_v4, %v801_v3 }
 0x224   : > { %1394 = vmatpush3.bf16.msra.mxu1 %v806_v5 }
 0x226   : > { %v954_v8 = vpop.permute.xlu1 %953  ;;  %v952_v9 = vpop.permute.xlu0 %951 }
 0x227   : > { %v962_v60 = vsel %vm959_vm0, %v952_v9, %v954_v8  ;;  %1111 = vmatmul.mubr.bf16.vlgmr.msra.gmra.mrb[0].mxu1 %v1348_v6 }
 0x228   : > { %1411 = vmatpush3.bf16.msra.mxu0 %v962_v60 }
 0x229   : > { %1412 = vmatprep.subr.bf16.mxu0 %v1847_v18 }
 0x22a   : > { %v958_v62 = vpop.permute.xlu1 %957  ;;  %v956_v10 = vpop.permute.xlu0 %955 }
 0x22b   : > { %v963_v11 = vsel %vm959_vm0, %v956_v10, %v958_v62 }
 0x22c   : > { %1413 = vmatpush3.bf16.msra.mxu0 %v963_v11 }
 0x22f   : > { %1415 = vmatmul.mubr.msk.bf16.vlgmr.msra.gmra.mrb[4].mxu0 %vm1034_vm1, %v1587_v13 }
 0x23b   : > { %v1015_v20 = vpop.permute.xlu0 %1014 }
 0x2e3   : > { %v1373_v49 = vpop.f32.mrb[0].mxu0 }
 0x2e4   : > { %v1374_v14 = vpop.f32.mrb[1].mxu0 }
 0x2e5   : > { %v1375_v15 = vadd.f32 %v1374_v14, %v1373_v49  ;;  %v1376_v16 = vpop.f32.mrb[2].mxu0 }
 0x2e6   : > { %v1377_v19 = vpop.f32.mrb[3].mxu0 }
 0x2e7   : > { %v1073_v22 = vadd.f32 %v1375_v15, %v1015_v20 }
 0x2fa   : > { %v1395_v18 = vpop.f32.mrb[0].mxu1 }
 0x2fb   : > { %v1396_v21 = vpop.f32.mrb[1].mxu1 }
 0x2fc   : > { %v1397_v35 = vadd.f32 %v1396_v21, %v1395_v18  ;;  %v1398_v24 = vpop.f32.mrb[2].mxu1 }
 0x2fd   : > { %v1399_v37 = vpop.f32.mrb[3].mxu1 }
 0x2fe   : > { %v1113_v38 = vadd.f32 %v1397_v35, %v1073_v22 }
 0x302   : > { %v1152_v39 = vpop.f32.mrb[4].mxu0 }
 0x303   : > { %v1153_v26 = vadd.f32 %v1152_v39, %v1113_v38  ;;  %v1416_v41 = vpop.f32.mrb[5].mxu0 }
 0x304   : > { %v1155_v36 = vpop.f32.mrb[6].mxu0 }
 0x305   : > { %1158 = vst [vmem:[%s2235_s15] sm:$0xff] %v1153_v26  ;;  %v1417_v45 = vpop.f32.mrb[7].mxu0 }
 0x306   : > { %1691 = shalt.err (!%p1688_p0)
}
 0x307   : > { %s1692_s29 = scalar_lea.hbm %s2531_s21, 128  ;;  %s1696_s16 = scalar_lea.hbm %s2691_s5, 512 }
 0x308   : > { %p1693_p9 = scmp.ne.s32.totalorder %s2531_s21, %s1692_s29  ;;  %p1697_p7 = scmp.lt.u32.totalorder %s2531_s21, %s2691_s5 }
 0x309   : > { %p1698_p1 = scmp.lt.u32.totalorder %s1696_s16, %s1692_s29  ;;  %p1700_p5 = scmp.lt.u32.totalorder %s1692_s29, %s2531_s21 }
 0x30a   : > { %p1694_p13 = pnand %p1693_p9, %p2692_p12 }
 0x30b   : > { %p1699_p3 = por %p1698_p1, %p1697_p7 }
 0x30c   : > { %p1695_p4 = pneg %p1694_p13 }
 0x30d   : > { %p1701_p6 = por %p1700_p5, %p1699_p3 }
 0x30f   : > { %p1702_p10 = pnand %p1701_p6, %p1695_p4 }
 0x311   : > { %1705 = shalt.err (!%p1702_p10)
}
 0x312   : > { %1424 = dma.vmem_to_hbm [thread:$0]  (%p2692_p12), %s2533_s26, 128, %s2531_s21, %s1160_s14  }
 0x313 PF: > { %s2693_s1 = sld [smem:[#allocation24_spill]]  ;;  %p1441_p8 = scmp.ge.s32.totalorder %s1836_s6, 2 }
 0x314   : > { %s1187_s17 = sand.u32 1, %s1808_s24  }
 0x315   : > { %s1188_s0 = scalar_lea.sflag [#allocation6], %s1187_s17 }
 0x319   : > { %p2694_p11 = scmp.ne.s32.totalorder %s2693_s1, 0 }
 0x31b   : > { %p1437_p2 = pnand %p1441_p8, %p2694_p11 }
 0x31d   : > { %1775 = dma.done.wait (!%p1437_p2), %s1188_s0, 128  }
 0x31e   : > { %1777 = vsyncadd (!%p1437_p2), %s1188_s0, 4294967168  ;;  %s24_s6 = sadd.s32 1, %s1836_s6   ;;  %s2696_s27 = sld [smem:[#allocation15_spill]] }
 0x31f   : > { %p2563_p0 = scmp.ge.s32.totalorder %s24_s6, 6   ;;  %s2697_s23 = sld [smem:[#allocation22_spill]] }
 0x320   : > { %s2698_s26 = sld [smem:[#allocation16_spill]]  ;;  %s2699_s11 = sld [smem:[#allocation23_spill]] }
 0x321   : > { %s2700_s14 = sld [smem:[#allocation19_spill]]  ;;  %s2701_s29 = sld [smem:[#allocation20_spill]] }
 0x322   : > { %s2702_s3 = sld [smem:[#allocation21_spill]]  ;;  %s2703_s18 = smov %s1788_s19 }
 0x323   : > { %s2704_s19 = smov %s1792_s20  ;;  %s2705_s20 = smov %s2158_s13 }
 0x324   : > { %s2706_s21 = smov %s1800_s22  ;;  %s2707_s22 = smov %s2696_s27 }
 0x325   : > { %s2708_s24 = smov %s1812_s25  ;;  %s2712_s28 = smov %s1832_s30 }
 0x326   : > { %s2709_s25 = smov %s2698_s26  ;;  %s2710_s26 = smov %s2699_s11 }
 0x327   : > { %s2711_s27 = smov %s2700_s14  ;;  %23 = sbr.rel (!%p2563_p0) target bundleno = 18 (0x12), region = 125 }
 0x328   : > { %s2713_s30 = smov %s2702_s3 }
 0x32e   :  { %1193 = vsyncpa [#allocation5], 1 }
 0x32f   :  { %1195 = vsyncpa [#allocation5 + $0x1], 1 }
 0x330   :  { %1196 = vsyncpa [#allocation8], 1 }
 0x331   :  { %1198 = vsyncpa [#allocation8 + $0x1], 1 }
 0x332   :  { %1199 = vsyncpa [#allocation6], 1 }
 0x333   :  { %1201 = vsyncpa [#allocation6 + $0x1], 1 }

</bundles_post_ra>
